<compile_context>
chip_gen: v7x
topology: tpu7x:2x2x1
jax: 0.10.0
libtpu: 0.0.40
codegen_flags: <defaults>
</compile_context>

<pallas_src>
import functools
import math

import jax
import jax.numpy as jnp
from jax.experimental import pallas as pl
from jax.experimental.pallas import tpu as pltpu


def _round_up(x, m):
    return ((x + m - 1) // m) * m


def _vmem_capacity_bytes():
    """Best-effort VMEM capacity query; conservative (v7x-safe) fallback."""
    try:
        get_info = getattr(pltpu, "get_tpu_info", None)
        if get_info is not None:
            info = get_info()
            for name in ("vmem_capacity_bytes", "vmem_size_bytes", "vmem_bytes"):
                v = getattr(info, name, None)
                if v:
                    return int(v)
    except Exception:
        pass
    return 64 * 1024 * 1024


def _approx_reciprocal(x):
    recip = getattr(pl, "reciprocal", None)
    if recip is not None:
        return recip(x, approx=True)   # EUP slot, effectively free
    return 1.0 / x


def _pick_block_windows(num_windows, tokens, target_rows):
    """Pick windows-per-block: divisor of num_windows, rows % 8 == 0, rows <= target."""
    divs = [d for d in range(1, num_windows + 1) if num_windows % d == 0]
    ok = [d for d in divs if (d * tokens) % 8 == 0]
    if not ok:
        # TODO(synk): odd window token counts would need token-axis padding; fall back
        # to a single full-extent block (allowed since it equals the full array dim).
        return num_windows
    under = [d for d in ok if d * tokens <= target_rows]
    if not under:
        return min(ok)
    bw = max(under)
    if num_windows // bw < 2:
        # Prefer >=2 blocks (v7x megacore sharding of the 'parallel' axis) as long as
        # each block still carries enough rows to keep the MXU fed.
        alts = [d for d in under if num_windows // d >= 2 and d * tokens >= 512]
        if alts:
            bw = max(alts)
    return bw


def _wmsa_attention_kernel(x_ref, wqkv_ref, bqkv_ref, wp_ref, bp_ref, o_ref,
                           qkv_ref, ctx_ref, *,
                           num_windows, win_tokens, num_heads, head_dim_p,
                           exact_softmax):
    B = num_windows              # whole windows handled by this grid step
    N = win_tokens               # tokens per window
    H = num_heads
    Dp = head_dim_p              # (possibly padded) per-head dim
    Cp = H * Dp
    cdt = qkv_ref.dtype          # bf16 (default) or f32 (exact checking path)

    # Fused Q/K/V projection: ONE (rows, Cin) x (Cin, 3*Cp) MXU matmul, f32 accumulate.
    # Softmax scale is already folded into the q columns of wqkv/bqkv.
    qkv = jnp.dot(x_ref[...], wqkv_ref[...], preferred_element_type=jnp.float32)
    qkv_ref[...] = (qkv + bqkv_ref[...]).astype(cdt)   # stage in VMEM scratch

    # TODO(synk): the additive window `mask` branch of Attention.forward (mask is not
    # None) is not implemented; only the default mask=None path.
    for h in range(H):                                  # static unroll, H is small
        c0 = h * Dp
        q_h = qkv_ref[:, c0:c0 + Dp]                    # (rows, Dp) slices of scratch
        k_h = qkv_ref[:, Cp + c0:Cp + c0 + Dp]
        v_h = qkv_ref[:, 2 * Cp + c0:2 * Cp + c0 + Dp]

        # Split windows along the row (sublane) axis only; minor dim untouched.
        q3 = q_h.reshape(B, N, Dp)
        k3 = k_h.reshape(B, N, Dp)
        v3 = v_h.reshape(B, N, Dp)

        s = jnp.einsum('bnd,bmd->bnm', q3, k3,
                       preferred_element_type=jnp.float32)        # (B, N, N) f32
        s = s - jnp.max(s, axis=-1, keepdims=True)
        e = jnp.exp(s)
        l = jnp.sum(e, axis=-1, keepdims=True)
        if exact_softmax:
            p = e / l
        else:
            p = e * _approx_reciprocal(l)                         # EUP reciprocal

        ctx = jnp.einsum('bnm,bmd->bnd', p.astype(cdt), v3,
                         preferred_element_type=jnp.float32)      # (B, N, Dp)
        # Park this head's context at its lane offset; the proj matmul runs once below.
        ctx_ref[:, c0:c0 + Dp] = ctx.reshape(B * N, Dp).astype(cdt)

    # Single K=Cp output projection (instead of H tiny K=Dh dots), f32 accumulate.
    out = jnp.dot(ctx_ref[...], wp_ref[...],
                  preferred_element_type=jnp.float32) + bp_ref[...]
    o_ref[...] = out.astype(o_ref.dtype)


def wmsa_attention(x, wq, bq, wkv, bkv, wp, bp, *, num_heads, qk_scale=None,
                   mask=None, use_bf16_matmul=True):
    """Forward of `Attention` (token_projection='linear', eval-mode dropouts).

    x:   (B_, N, C)   windows-of-tokens input
    wq:  (C, C),  bq:  (C,)    to_q  Linear params (PyTorch (out, in) layout)
    wkv: (2C, C), bkv: (2C,)   to_kv Linear params
    wp:  (C, C),  bp:  (C,)    proj  Linear params
    returns: (B_, N, C)
    """
    assert mask is None  # TODO(synk): additive window-mask branch not implemented.
    B_, N, C = x.shape
    H = num_heads
    Dh = C // H
    assert H * Dh == C
    scale = float(qk_scale) if qk_scale is not None else float(Dh) ** (-0.5)
    out_dtype = x.dtype
    f32 = jnp.float32

    # ---- lane-dense padding (only kicks in when C is not a multiple of 128) --------
    LANE = 128
    cin_p = _round_up(C, LANE)        # padded input-channel dim (x / wqkv rows)
    cout_p = _round_up(C, LANE)       # padded output-channel dim (proj cols / output)
    if C % LANE == 0:
        dh_p = Dh
    else:
        step = LANE // math.gcd(H, LANE)
        dh_p = _round_up(Dh, step)    # per-head padding so concat-head dim is 128-dense
        if H * dh_p > 4 * cin_p:      # guard against blow-up for awkward head counts
            dh_p = Dh
    cp = H * dh_p                     # padded concat-head dim

    # ---- fold the two projection Linears into one x@W matrix [q | k | v] -----------
    # Softmax scale folded into the q columns (weights AND bias), done once at setup.
    wq_t = (wq.T * scale).astype(f32)               # (C, C)
    wk_t = wkv[:C].T.astype(f32)
    wv_t = wkv[C:].T.astype(f32)
    bq_s = (bq * scale).astype(f32)
    bk = bkv[:C].astype(f32)
    bv = bkv[C:].astype(f32)

    def pad_w(w):      # (C, C) -> (cin_p, cp): pad input rows + per-head output lanes
        w = w.reshape(C, H, Dh)
        w = jnp.pad(w, ((0, cin_p - C), (0, 0), (0, dh_p - Dh)))
        return w.reshape(cin_p, cp)

    def pad_b(b):      # (C,) -> (cp,)
        return jnp.pad(b.reshape(H, Dh), ((0, 0), (0, dh_p - Dh))).reshape(cp)

    wqkv = jnp.concatenate([pad_w(wq_t), pad_w(wk_t), pad_w(wv_t)], axis=1)  # (cin_p,3cp)
    bqkv = jnp.concatenate([pad_b(bq_s), pad_b(bk), pad_b(bv)]).reshape(1, 3 * cp)

    wp_t = wp.T.astype(f32).reshape(H, Dh, C)       # rows = concat-head channels
    wp_p = jnp.pad(wp_t, ((0, 0), (0, dh_p - Dh), (0, cout_p - C))).reshape(cp, cout_p)
    bp_p = jnp.pad(bp.astype(f32), (0, cout_p - C)).reshape(1, cout_p)

    x2d = jnp.pad(x.reshape(B_ * N, C).astype(f32), ((0, 0), (0, cin_p - C)))

    # bf16 MXU inputs (default) with f32 accumulation in-kernel; biases stay f32.
    compute_dtype = jnp.bfloat16 if use_bf16_matmul else jnp.float32
    x2d = x2d.astype(compute_dtype)
    wqkv = wqkv.astype(compute_dtype)
    wp_p = wp_p.astype(compute_dtype)

    # ---- window-block tiling (VMEM-capacity aware) ---------------------------------
    vmem_cap = _vmem_capacity_bytes()
    target_rows = 2048 if vmem_cap >= (100 << 20) else 1024   # v5e/v6e vs v7x
    bw = _pick_block_windows(B_, N, target_rows)
    rows = bw * N
    num_blocks = B_ // bw

    it = jnp.dtype(compute_dtype).itemsize
    out_it = jnp.dtype(out_dtype).itemsize
    est = (2 * rows * cin_p * it                    # double-buffered x blocks
           + 2 * rows * cout_p * out_it             # double-buffered out blocks
           + rows * 3 * cp * it + rows * cp * it    # qkv + ctx scratch
           + 2 * (cin_p * 3 * cp + cp * cout_p) * it
           + 2 * (3 * cp + cout_p) * 4)
    vmem_limit = int(min(0.75 * vmem_cap, max(32 << 20, 2 * est)))

    kernel = functools.partial(
        _wmsa_attention_kernel,
        num_windows=bw, win_tokens=N, num_heads=H, head_dim_p=dh_p,
        exact_softmax=not use_bf16_matmul)

    out2d = pl.pallas_call(
        kernel,
        out_shape=jax.ShapeDtypeStruct((B_ * N, cout_p), out_dtype),
        grid_spec=pltpu.PrefetchScalarGridSpec(
            num_scalar_prefetch=0,
            grid=(num_blocks,),
            in_specs=[
                pl.BlockSpec((rows, cin_p), lambda i: (i, 0)),     # x rows of block i
                pl.BlockSpec((cin_p, 3 * cp), lambda i: (0, 0)),   # fused qkv weight
                pl.BlockSpec((1, 3 * cp), lambda i: (0, 0)),       # fused qkv bias
                pl.BlockSpec((cp, cout_p), lambda i: (0, 0)),      # proj weight (x@W)
                pl.BlockSpec((1, cout_p), lambda i: (0, 0)),       # proj bias
            ],
            out_specs=pl.BlockSpec((rows, cout_p), lambda i: (i, 0)),
            scratch_shapes=[
                pltpu.VMEM((rows, 3 * cp), compute_dtype),         # staged qkv
                pltpu.VMEM((rows, cp), compute_dtype),             # concat-head ctx
            ],
        ),
        compiler_params=pltpu.CompilerParams(
            dimension_semantics=("parallel",),
            vmem_limit_bytes=vmem_limit),
    )(x2d, wqkv, bqkv, wp_p, bp_p)

    return out2d[:, :C].reshape(B_, N, C)


def _reference(x, wq, bq, wkv, bkv, wp, bp, num_heads, qk_scale=None):
    """Pure-JAX reference mirroring the PyTorch forward (mask=None, eval mode)."""
    B_, N, C = x.shape
    H = num_heads
    Dh = C // H
    scale = qk_scale if qk_scale is not None else Dh ** (-0.5)
    hi = jax.lax.Precision.HIGHEST
    q = jnp.einsum('bnc,oc->bno', x, wq, precision=hi) + bq
    kv = jnp.einsum('bnc,oc->bno', x, wkv, precision=hi) + bkv
    q = q.reshape(B_, N, H, Dh).transpose(0, 2, 1, 3) * scale
    k = kv[..., :C].reshape(B_, N, H, Dh).transpose(0, 2, 1, 3)
    v = kv[..., C:].reshape(B_, N, H, Dh).transpose(0, 2, 1, 3)
    attn = jax.nn.softmax(jnp.einsum('bhnd,bhmd->bhnm', q, k, precision=hi), axis=-1)
    ctx = jnp.einsum('bhnm,bhmd->bhnd', attn, v, precision=hi)
    ctx = ctx.transpose(0, 2, 1, 3).reshape(B_, N, C)
    return jnp.einsum('bnc,oc->bno', ctx, wp, precision=hi) + bp


if __name__ == "__main__":
    # Small shapes consistent with the module: 2 windows, 8 tokens each, dim=32, 4 heads.
    B_, N, dim, num_heads = 2, 8, 32, 4

    key = jax.random.PRNGKey(0)
    ks = jax.random.split(key, 7)
    x = jax.random.normal(ks[0], (B_, N, dim), dtype=jnp.float32)
    wq = jax.random.normal(ks[1], (dim, dim), dtype=jnp.float32) * 0.1
    bq = jax.random.normal(ks[2], (dim,), dtype=jnp.float32) * 0.1
    wkv = jax.random.normal(ks[3], (2 * dim, dim), dtype=jnp.float32) * 0.1
    bkv = jax.random.normal(ks[4], (2 * dim,), dtype=jnp.float32) * 0.1
    wp = jax.random.normal(ks[5], (dim, dim), dtype=jnp.float32) * 0.1
    bp = jax.random.normal(ks[6], (dim,), dtype=jnp.float32) * 0.1

    ref = jax.block_until_ready(
        _reference(x, wq, bq, wkv, bkv, wp, bp, num_heads))

    # Default (performance) path: bf16 MXU inputs, f32 accumulation.
    out_bf16 = jax.block_until_ready(
        wmsa_attention(x, wq, bq, wkv, bkv, wp, bp, num_heads=num_heads))
    assert out_bf16.shape == (B_, N, dim), out_bf16.shape
    assert jnp.allclose(out_bf16, ref, atol=3e-2, rtol=3e-2), (
        float(jnp.max(jnp.abs(out_bf16 - ref))))

    # Exact f32 path: tight tolerance so wiring/layout regressions cannot hide.
    out_f32 = jax.block_until_ready(
        wmsa_attention(x, wq, bq, wkv, bkv, wp, bp, num_heads=num_heads,
                       use_bf16_matmul=False))
    assert jnp.allclose(out_f32, ref, atol=5e-3, rtol=5e-3), (
        float(jnp.max(jnp.abs(out_f32 - ref))))

    print("KERNEL_OK")
</pallas_src>

<mosaic_0001>
module attributes {stable_mosaic.version = 11 : i64} {
  func.func @_wmsa_attention_kernel(%arg0: i32, %arg1: memref<16x128xbf16, #tpu.memory_space<vmem>>, %arg2: memref<128x384xbf16, #tpu.memory_space<vmem>>, %arg3: memref<1x384xf32, #tpu.memory_space<vmem>>, %arg4: memref<128x128xbf16, #tpu.memory_space<vmem>>, %arg5: memref<1x128xf32, #tpu.memory_space<vmem>>, %arg6: memref<16x128xf32, #tpu.memory_space<vmem>>, %arg7: memref<16x384xbf16, #tpu.memory_space<vmem>>, %arg8: memref<16x128xbf16, #tpu.memory_space<vmem>>) attributes {dimension_semantics = [#tpu.dimension_semantics<parallel>], iteration_bounds = array<i64: 1>, scalar_prefetch = 0 : i64, scratch_operands = 2 : i64, tpu.core_type = #tpu.core_type<tc>, window_params = [{transform_indices = @transform_0, window_bounds = array<i64: 16, 128>}, {pipeline_mode = #tpu.pipeline_mode<synchronous>, transform_indices = @transform_1, window_bounds = array<i64: 128, 384>}, {pipeline_mode = #tpu.pipeline_mode<synchronous>, transform_indices = @transform_2, window_bounds = array<i64: 1, 384>}, {pipeline_mode = #tpu.pipeline_mode<synchronous>, transform_indices = @transform_3, window_bounds = array<i64: 128, 128>}, {pipeline_mode = #tpu.pipeline_mode<synchronous>, transform_indices = @transform_4, window_bounds = array<i64: 1, 128>}, {transform_indices = @transform_5, window_bounds = array<i64: 16, 128>}]} {
    %c0 = arith.constant 0 : index
    %c0_0 = arith.constant 0 : index
    %0 = vector.load %arg1[%c0, %c0_0] : memref<16x128xbf16, #tpu.memory_space<vmem>>, vector<16x128xbf16>
    %c0_1 = arith.constant 0 : index
    %c0_2 = arith.constant 0 : index
    %1 = vector.load %arg2[%c0_1, %c0_2] : memref<128x384xbf16, #tpu.memory_space<vmem>>, vector<128x384xbf16>
    %cst = arith.constant dense<0.000000e+00> : vector<16x384xf32>
    %2 = tpu.matmul %0, %1, %cst {dimension_numbers = #tpu.dot_dimension_numbers<[1], [0], [0], [1], [0, 0, 1, 1], [], []>} : vector<16x128xbf16>, vector<128x384xbf16>, vector<16x384xf32> -> vector<16x384xf32>
    %c0_3 = arith.constant 0 : index
    %c0_4 = arith.constant 0 : index
    %3 = vector.load %arg3[%c0_3, %c0_4] : memref<1x384xf32, #tpu.memory_space<vmem>>, vector<1x384xf32>
    %4 = vector.broadcast %3 : vector<1x384xf32> to vector<16x384xf32>
    %5 = arith.addf %2, %4 : vector<16x384xf32>
    %6 = arith.truncf %5 : vector<16x384xf32> to vector<16x384xbf16>
    %c0_5 = arith.constant 0 : index
    %c0_6 = arith.constant 0 : index
    %7 = vector.load %arg7[%c0_5, %c0_6] : memref<16x384xbf16, #tpu.memory_space<vmem>>, vector<16x384xbf16>
    tpu.vector_store %arg7[%c0_5, %c0_6], %6 {strides = array<i32>} : memref<16x384xbf16, #tpu.memory_space<vmem>>, vector<16x384xbf16>,
    %c0_7 = arith.constant 0 : index
    %c0_8 = arith.constant 0 : index
    %8 = vector.load %arg7[%c0_7, %c0_8] : memref<16x384xbf16, #tpu.memory_space<vmem>>, vector<16x32xbf16>
    %c0_9 = arith.constant 0 : index
    %c128 = arith.constant 128 : index
    %9 = vector.load %arg7[%c0_9, %c128] : memref<16x384xbf16, #tpu.memory_space<vmem>>, vector<16x32xbf16>
    %c0_10 = arith.constant 0 : index
    %c256 = arith.constant 256 : index
    %10 = vector.load %arg7[%c0_10, %c256] : memref<16x384xbf16, #tpu.memory_space<vmem>>, vector<16x32xbf16>
    %11 = vector.shape_cast %8 : vector<16x32xbf16> to vector<2x8x32xbf16>
    %12 = vector.shape_cast %9 : vector<16x32xbf16> to vector<2x8x32xbf16>
    %13 = vector.shape_cast %10 : vector<16x32xbf16> to vector<2x8x32xbf16>
    "tpu.trace_start"() <{level = 10 : i32, message = "bnd,bmd->bnm"}> : () -> ()
    %cst_11 = arith.constant dense<0.000000e+00> : vector<2x8x8xf32>
    %14 = tpu.matmul %11, %12, %cst_11 {dimension_numbers = #tpu.dot_dimension_numbers<[2], [2], [1], [1], [0, 0, 0, 1, 1, 1], [0], [0]>} : vector<2x8x32xbf16>, vector<2x8x32xbf16>, vector<2x8x8xf32> -> vector<2x8x8xf32>
    "tpu.trace_stop"() : () -> ()
    %cst_12 = arith.constant dense<0xFF800000> : vector<2x8xf32>
    %15 = vector.multi_reduction <maximumf>, %14, %cst_12 [2] : vector<2x8x8xf32> to vector<2x8xf32>
    %16 = vector.shape_cast %15 : vector<2x8xf32> to vector<2x8x1xf32>
    %17 = vector.broadcast %16 : vector<2x8x1xf32> to vector<2x8x8xf32>
    %18 = arith.subf %14, %17 : vector<2x8x8xf32>
    %19 = math.exp %18 : vector<2x8x8xf32>
    %cst_13 = arith.constant dense<0.000000e+00> : vector<2x8xf32>
    %20 = vector.multi_reduction <add>, %19, %cst_13 [2] : vector<2x8x8xf32> to vector<2x8xf32>
    %21 = vector.shape_cast %20 : vector<2x8xf32> to vector<2x8x1xf32>
    %22 = tpu.reciprocal %21 {approx = true} : vector<2x8x1xf32> -> vector<2x8x1xf32>
    %23 = vector.broadcast %22 : vector<2x8x1xf32> to vector<2x8x8xf32>
    %24 = arith.mulf %19, %23 : vector<2x8x8xf32>
    %25 = arith.truncf %24 : vector<2x8x8xf32> to vector<2x8x8xbf16>
    "tpu.trace_start"() <{level = 10 : i32, message = "bnm,bmd->bnd"}> : () -> ()
    %cst_14 = arith.constant dense<0.000000e+00> : vector<2x8x32xf32>
    %26 = tpu.matmul %25, %13, %cst_14 {dimension_numbers = #tpu.dot_dimension_numbers<[2], [1], [1], [2], [0, 0, 0, 1, 1, 2], [0], [0]>} : vector<2x8x8xbf16>, vector<2x8x32xbf16>, vector<2x8x32xf32> -> vector<2x8x32xf32>
    "tpu.trace_stop"() : () -> ()
    %27 = vector.shape_cast %26 : vector<2x8x32xf32> to vector<16x32xf32>
    %28 = arith.truncf %27 : vector<16x32xf32> to vector<16x32xbf16>
    %c0_15 = arith.constant 0 : index
    %c0_16 = arith.constant 0 : index
    %29 = vector.load %arg8[%c0_15, %c0_16] : memref<16x128xbf16, #tpu.memory_space<vmem>>, vector<16x32xbf16>
    tpu.vector_store %arg8[%c0_15, %c0_16], %28 {strides = array<i32>} : memref<16x128xbf16, #tpu.memory_space<vmem>>, vector<16x32xbf16>,
    %c0_17 = arith.constant 0 : index
    %c32 = arith.constant 32 : index
    %30 = vector.load %arg7[%c0_17, %c32] : memref<16x384xbf16, #tpu.memory_space<vmem>>, vector<16x32xbf16>
    %c0_18 = arith.constant 0 : index
    %c160 = arith.constant 160 : index
    %31 = vector.load %arg7[%c0_18, %c160] : memref<16x384xbf16, #tpu.memory_space<vmem>>, vector<16x32xbf16>
    %c0_19 = arith.constant 0 : index
    %c288 = arith.constant 288 : index
    %32 = vector.load %arg7[%c0_19, %c288] : memref<16x384xbf16, #tpu.memory_space<vmem>>, vector<16x32xbf16>
    %33 = vector.shape_cast %30 : vector<16x32xbf16> to vector<2x8x32xbf16>
    %34 = vector.shape_cast %31 : vector<16x32xbf16> to vector<2x8x32xbf16>
    %35 = vector.shape_cast %32 : vector<16x32xbf16> to vector<2x8x32xbf16>
    "tpu.trace_start"() <{level = 10 : i32, message = "bnd,bmd->bnm"}> : () -> ()
    %cst_20 = arith.constant dense<0.000000e+00> : vector<2x8x8xf32>
    %36 = tpu.matmul %33, %34, %cst_20 {dimension_numbers = #tpu.dot_dimension_numbers<[2], [2], [1], [1], [0, 0, 0, 1, 1, 1], [0], [0]>} : vector<2x8x32xbf16>, vector<2x8x32xbf16>, vector<2x8x8xf32> -> vector<2x8x8xf32>
    "tpu.trace_stop"() : () -> ()
    %cst_21 = arith.constant dense<0xFF800000> : vector<2x8xf32>
    %37 = vector.multi_reduction <maximumf>, %36, %cst_21 [2] : vector<2x8x8xf32> to vector<2x8xf32>
    %38 = vector.shape_cast %37 : vector<2x8xf32> to vector<2x8x1xf32>
    %39 = vector.broadcast %38 : vector<2x8x1xf32> to vector<2x8x8xf32>
    %40 = arith.subf %36, %39 : vector<2x8x8xf32>
    %41 = math.exp %40 : vector<2x8x8xf32>
    %cst_22 = arith.constant dense<0.000000e+00> : vector<2x8xf32>
    %42 = vector.multi_reduction <add>, %41, %cst_22 [2] : vector<2x8x8xf32> to vector<2x8xf32>
    %43 = vector.shape_cast %42 : vector<2x8xf32> to vector<2x8x1xf32>
    %44 = tpu.reciprocal %43 {approx = true} : vector<2x8x1xf32> -> vector<2x8x1xf32>
    %45 = vector.broadcast %44 : vector<2x8x1xf32> to vector<2x8x8xf32>
    %46 = arith.mulf %41, %45 : vector<2x8x8xf32>
    %47 = arith.truncf %46 : vector<2x8x8xf32> to vector<2x8x8xbf16>
    "tpu.trace_start"() <{level = 10 : i32, message = "bnm,bmd->bnd"}> : () -> ()
    %cst_23 = arith.constant dense<0.000000e+00> : vector<2x8x32xf32>
    %48 = tpu.matmul %47, %35, %cst_23 {dimension_numbers = #tpu.dot_dimension_numbers<[2], [1], [1], [2], [0, 0, 0, 1, 1, 2], [0], [0]>} : vector<2x8x8xbf16>, vector<2x8x32xbf16>, vector<2x8x32xf32> -> vector<2x8x32xf32>
    "tpu.trace_stop"() : () -> ()
    %49 = vector.shape_cast %48 : vector<2x8x32xf32> to vector<16x32xf32>
    %50 = arith.truncf %49 : vector<16x32xf32> to vector<16x32xbf16>
    %c0_24 = arith.constant 0 : index
    %c32_25 = arith.constant 32 : index
    %51 = vector.load %arg8[%c0_24, %c32_25] : memref<16x128xbf16, #tpu.memory_space<vmem>>, vector<16x32xbf16>
    tpu.vector_store %arg8[%c0_24, %c32_25], %50 {strides = array<i32>} : memref<16x128xbf16, #tpu.memory_space<vmem>>, vector<16x32xbf16>,
    %c0_26 = arith.constant 0 : index
    %c64 = arith.constant 64 : index
    %52 = vector.load %arg7[%c0_26, %c64] : memref<16x384xbf16, #tpu.memory_space<vmem>>, vector<16x32xbf16>
    %c0_27 = arith.constant 0 : index
    %c192 = arith.constant 192 : index
    %53 = vector.load %arg7[%c0_27, %c192] : memref<16x384xbf16, #tpu.memory_space<vmem>>, vector<16x32xbf16>
    %c0_28 = arith.constant 0 : index
    %c320 = arith.constant 320 : index
    %54 = vector.load %arg7[%c0_28, %c320] : memref<16x384xbf16, #tpu.memory_space<vmem>>, vector<16x32xbf16>
    %55 = vector.shape_cast %52 : vector<16x32xbf16> to vector<2x8x32xbf16>
    %56 = vector.shape_cast %53 : vector<16x32xbf16> to vector<2x8x32xbf16>
    %57 = vector.shape_cast %54 : vector<16x32xbf16> to vector<2x8x32xbf16>
    "tpu.trace_start"() <{level = 10 : i32, message = "bnd,bmd->bnm"}> : () -> ()
    %cst_29 = arith.constant dense<0.000000e+00> : vector<2x8x8xf32>
    %58 = tpu.matmul %55, %56, %cst_29 {dimension_numbers = #tpu.dot_dimension_numbers<[2], [2], [1], [1], [0, 0, 0, 1, 1, 1], [0], [0]>} : vector<2x8x32xbf16>, vector<2x8x32xbf16>, vector<2x8x8xf32> -> vector<2x8x8xf32>
    "tpu.trace_stop"() : () -> ()
    %cst_30 = arith.constant dense<0xFF800000> : vector<2x8xf32>
    %59 = vector.multi_reduction <maximumf>, %58, %cst_30 [2] : vector<2x8x8xf32> to vector<2x8xf32>
    %60 = vector.shape_cast %59 : vector<2x8xf32> to vector<2x8x1xf32>
    %61 = vector.broadcast %60 : vector<2x8x1xf32> to vector<2x8x8xf32>
    %62 = arith.subf %58, %61 : vector<2x8x8xf32>
    %63 = math.exp %62 : vector<2x8x8xf32>
    %cst_31 = arith.constant dense<0.000000e+00> : vector<2x8xf32>
    %64 = vector.multi_reduction <add>, %63, %cst_31 [2] : vector<2x8x8xf32> to vector<2x8xf32>
    %65 = vector.shape_cast %64 : vector<2x8xf32> to vector<2x8x1xf32>
    %66 = tpu.reciprocal %65 {approx = true} : vector<2x8x1xf32> -> vector<2x8x1xf32>
    %67 = vector.broadcast %66 : vector<2x8x1xf32> to vector<2x8x8xf32>
    %68 = arith.mulf %63, %67 : vector<2x8x8xf32>
    %69 = arith.truncf %68 : vector<2x8x8xf32> to vector<2x8x8xbf16>
    "tpu.trace_start"() <{level = 10 : i32, message = "bnm,bmd->bnd"}> : () -> ()
    %cst_32 = arith.constant dense<0.000000e+00> : vector<2x8x32xf32>
    %70 = tpu.matmul %69, %57, %cst_32 {dimension_numbers = #tpu.dot_dimension_numbers<[2], [1], [1], [2], [0, 0, 0, 1, 1, 2], [0], [0]>} : vector<2x8x8xbf16>, vector<2x8x32xbf16>, vector<2x8x32xf32> -> vector<2x8x32xf32>
    "tpu.trace_stop"() : () -> ()
    %71 = vector.shape_cast %70 : vector<2x8x32xf32> to vector<16x32xf32>
    %72 = arith.truncf %71 : vector<16x32xf32> to vector<16x32xbf16>
    %c0_33 = arith.constant 0 : index
    %c64_34 = arith.constant 64 : index
    %73 = vector.load %arg8[%c0_33, %c64_34] : memref<16x128xbf16, #tpu.memory_space<vmem>>, vector<16x32xbf16>
    tpu.vector_store %arg8[%c0_33, %c64_34], %72 {strides = array<i32>} : memref<16x128xbf16, #tpu.memory_space<vmem>>, vector<16x32xbf16>,
    %c0_35 = arith.constant 0 : index
    %c96 = arith.constant 96 : index
    %74 = vector.load %arg7[%c0_35, %c96] : memref<16x384xbf16, #tpu.memory_space<vmem>>, vector<16x32xbf16>
    %c0_36 = arith.constant 0 : index
    %c224 = arith.constant 224 : index
    %75 = vector.load %arg7[%c0_36, %c224] : memref<16x384xbf16, #tpu.memory_space<vmem>>, vector<16x32xbf16>
    %c0_37 = arith.constant 0 : index
    %c352 = arith.constant 352 : index
    %76 = vector.load %arg7[%c0_37, %c352] : memref<16x384xbf16, #tpu.memory_space<vmem>>, vector<16x32xbf16>
    %77 = vector.shape_cast %74 : vector<16x32xbf16> to vector<2x8x32xbf16>
    %78 = vector.shape_cast %75 : vector<16x32xbf16> to vector<2x8x32xbf16>
    %79 = vector.shape_cast %76 : vector<16x32xbf16> to vector<2x8x32xbf16>
    "tpu.trace_start"() <{level = 10 : i32, message = "bnd,bmd->bnm"}> : () -> ()
    %cst_38 = arith.constant dense<0.000000e+00> : vector<2x8x8xf32>
    %80 = tpu.matmul %77, %78, %cst_38 {dimension_numbers = #tpu.dot_dimension_numbers<[2], [2], [1], [1], [0, 0, 0, 1, 1, 1], [0], [0]>} : vector<2x8x32xbf16>, vector<2x8x32xbf16>, vector<2x8x8xf32> -> vector<2x8x8xf32>
    "tpu.trace_stop"() : () -> ()
    %cst_39 = arith.constant dense<0xFF800000> : vector<2x8xf32>
    %81 = vector.multi_reduction <maximumf>, %80, %cst_39 [2] : vector<2x8x8xf32> to vector<2x8xf32>
    %82 = vector.shape_cast %81 : vector<2x8xf32> to vector<2x8x1xf32>
    %83 = vector.broadcast %82 : vector<2x8x1xf32> to vector<2x8x8xf32>
    %84 = arith.subf %80, %83 : vector<2x8x8xf32>
    %85 = math.exp %84 : vector<2x8x8xf32>
    %cst_40 = arith.constant dense<0.000000e+00> : vector<2x8xf32>
    %86 = vector.multi_reduction <add>, %85, %cst_40 [2] : vector<2x8x8xf32> to vector<2x8xf32>
    %87 = vector.shape_cast %86 : vector<2x8xf32> to vector<2x8x1xf32>
    %88 = tpu.reciprocal %87 {approx = true} : vector<2x8x1xf32> -> vector<2x8x1xf32>
    %89 = vector.broadcast %88 : vector<2x8x1xf32> to vector<2x8x8xf32>
    %90 = arith.mulf %85, %89 : vector<2x8x8xf32>
    %91 = arith.truncf %90 : vector<2x8x8xf32> to vector<2x8x8xbf16>
    "tpu.trace_start"() <{level = 10 : i32, message = "bnm,bmd->bnd"}> : () -> ()
    %cst_41 = arith.constant dense<0.000000e+00> : vector<2x8x32xf32>
    %92 = tpu.matmul %91, %79, %cst_41 {dimension_numbers = #tpu.dot_dimension_numbers<[2], [1], [1], [2], [0, 0, 0, 1, 1, 2], [0], [0]>} : vector<2x8x8xbf16>, vector<2x8x32xbf16>, vector<2x8x32xf32> -> vector<2x8x32xf32>
    "tpu.trace_stop"() : () -> ()
    %93 = vector.shape_cast %92 : vector<2x8x32xf32> to vector<16x32xf32>
    %94 = arith.truncf %93 : vector<16x32xf32> to vector<16x32xbf16>
    %c0_42 = arith.constant 0 : index
    %c96_43 = arith.constant 96 : index
    %95 = vector.load %arg8[%c0_42, %c96_43] : memref<16x128xbf16, #tpu.memory_space<vmem>>, vector<16x32xbf16>
    tpu.vector_store %arg8[%c0_42, %c96_43], %94 {strides = array<i32>} : memref<16x128xbf16, #tpu.memory_space<vmem>>, vector<16x32xbf16>,
    %c0_44 = arith.constant 0 : index
    %c0_45 = arith.constant 0 : index
    %96 = vector.load %arg8[%c0_44, %c0_45] : memref<16x128xbf16, #tpu.memory_space<vmem>>, vector<16x128xbf16>
    %c0_46 = arith.constant 0 : index
    %c0_47 = arith.constant 0 : index
    %97 = vector.load %arg4[%c0_46, %c0_47] : memref<128x128xbf16, #tpu.memory_space<vmem>>, vector<128x128xbf16>
    %cst_48 = arith.constant dense<0.000000e+00> : vector<16x128xf32>
    %98 = tpu.matmul %96, %97, %cst_48 {dimension_numbers = #tpu.dot_dimension_numbers<[1], [0], [0], [1], [0, 0, 1, 1], [], []>} : vector<16x128xbf16>, vector<128x128xbf16>, vector<16x128xf32> -> vector<16x128xf32>
    %c0_49 = arith.constant 0 : index
    %c0_50 = arith.constant 0 : index
    %99 = vector.load %arg5[%c0_49, %c0_50] : memref<1x128xf32, #tpu.memory_space<vmem>>, vector<1x128xf32>
    %100 = vector.broadcast %99 : vector<1x128xf32> to vector<16x128xf32>
    %101 = arith.addf %98, %100 : vector<16x128xf32>
    %c0_51 = arith.constant 0 : index
    %c0_52 = arith.constant 0 : index
    %102 = vector.load %arg6[%c0_51, %c0_52] : memref<16x128xf32, #tpu.memory_space<vmem>>, vector<16x128xf32>
    tpu.vector_store %arg6[%c0_51, %c0_52], %101 {strides = array<i32>} : memref<16x128xf32, #tpu.memory_space<vmem>>, vector<16x128xf32>,
    return
  }
  func.func @transform_0(%arg0: i32) -> (i32, i32) {
    %c0_i32 = arith.constant 0 : i32
    %c0_i32_0 = arith.constant 0 : i32
    return %arg0, %c0_i32 : i32, i32
  }
  func.func @transform_1(%arg0: i32) -> (i32, i32) {
    %c0_i32 = arith.constant 0 : i32
    %c0_i32_0 = arith.constant 0 : i32
    %c0_i32_1 = arith.constant 0 : i32
    return %c0_i32, %c0_i32_0 : i32, i32
  }
  func.func @transform_2(%arg0: i32) -> (i32, i32) {
    %c0_i32 = arith.constant 0 : i32
    %c0_i32_0 = arith.constant 0 : i32
    %c0_i32_1 = arith.constant 0 : i32
    return %c0_i32, %c0_i32_0 : i32, i32
  }
  func.func @transform_3(%arg0: i32) -> (i32, i32) {
    %c0_i32 = arith.constant 0 : i32
    %c0_i32_0 = arith.constant 0 : i32
    %c0_i32_1 = arith.constant 0 : i32
    return %c0_i32, %c0_i32_0 : i32, i32
  }
  func.func @transform_4(%arg0: i32) -> (i32, i32) {
    %c0_i32 = arith.constant 0 : i32
    %c0_i32_0 = arith.constant 0 : i32
    %c0_i32_1 = arith.constant 0 : i32
    return %c0_i32, %c0_i32_0 : i32, i32
  }
  func.func @transform_5(%arg0: i32) -> (i32, i32) {
    %c0_i32 = arith.constant 0 : i32
    %c0_i32_0 = arith.constant 0 : i32
    return %arg0, %c0_i32 : i32, i32
  }
}

</mosaic_0001>

<bundles_post_ra>
// kernel: tpu_custom_call.1
= control target key start
LH: loop header
LB: loop body
LE: loop exit
PB: predicated region body
PF: predicated region fallthrough
CT: control target
= control target key end

     0   :  { %10 = vsyncpa [#allocation5], 0  ;;  %s2171_s0 = inlined_call_operand.hbm [shape: bf16[16,128], index: 0, kind: input, shape index: {}]   ;;  %s2172_s1 = inlined_call_operand.hbm [shape: bf16[128,384], index: 1, kind: input, shape index: {}]   ;;  %s2173_s2 = inlined_call_operand.vmem [shape: f32[1,384], index: 2, kind: input, shape index: {}]   ;;  %s2174_s3 = inlined_call_operand.hbm [shape: bf16[128,128], index: 3, kind: input, shape index: {}]   ;;  %s2175_s4 = inlined_call_operand.vmem [shape: f32[1,128], index: 4, kind: input, shape index: {}]   ;;  %s2176_s5 = inlined_call_operand.hbm [shape: f32[16,128], index: 5, kind: output, shape index: {}]  }
   0x1   :  { %11 = vsyncpa [#allocation8], 0 }
   0x2   :  { %12 = vsyncpa [#allocation6], 0  ;;  %s1885_s18 = smov [#allocation7]   ;;  %s1791_s22 = scalar_lea.hbm %s2172_s1, 3072 }
   0x3   :  { %s30_s19 = sshll.u32 %s1885_s18, 4  ;;  %p1792_p0 = scmp.ne.s32.totalorder %s2172_s1, %s1791_s22  ;;  %s31_s19 = int_to_ptr.vmem [resolvable:$true] %s30_s19 }
   0x4   :  { %p1795_p1 = scmp.lt.u32.totalorder %s1791_s22, %s2172_s1 }
   0x6   :  { %p1797_p2 = pnand %p1795_p1, %p1792_p0 }
   0x8   :  { %1800 = shalt.err (!%p1797_p2)
}
   0x9   :  { %s1801_s27 = scalar_lea.vmem %s31_s19, 3072  ;;  %p1806_p4 = scmp.lt.s32.totalorder %s31_s19, %s31_s19 }
   0xa   :  { %p1802_p3 = scmp.ne.s32.totalorder %s31_s19, %s1801_s27  ;;  %p1807_p5 = scmp.lt.s32.totalorder %s1801_s27, %s1801_s27 }
   0xc   :  { %p1808_p6 = por %p1807_p5, %p1806_p4 }
   0xe   :  { %p1809_p7 = pnand %p1808_p6, %p1802_p3 }
  0x10   :  { %1812 = shalt.err (!%p1809_p7)
}
  0x11   :  { %s1886_s28 = smov 192   ;;  %s1887_s29 = smov 12  }
  0x12   :  { %36 = dma.hbm_to_vmem [thread:$0]  %s2172_s1, 3072, %s31_s19, [#allocation8], %s1886_s28, %s1886_s28, %s1887_s29  }
  0x13   :  { %s1888_s7 = smov [#allocation4]   ;;  %s1813_s11 = scalar_lea.hbm %s2171_s0, 128 }
  0x14   :  { %s18_s8 = sshll.u32 %s1888_s7, 4  ;;  %p1814_p8 = scmp.ne.s32.totalorder %s2171_s0, %s1813_s11  ;;  %s19_s8 = int_to_ptr.vmem [resolvable:$true] %s18_s8 }
  0x15   :  { %p1817_p9 = scmp.lt.u32.totalorder %s1813_s11, %s2171_s0 }
  0x17   :  { %p1819_p10 = pnand %p1817_p9, %p1814_p8 }
  0x19   :  { %1822 = shalt.err (!%p1819_p10)
}
  0x1a   :  { %s1823_s16 = scalar_lea.vmem %s19_s8, 128  ;;  %p1828_p12 = scmp.lt.s32.totalorder %s19_s8, %s19_s8 }
  0x1b   :  { %p1824_p11 = scmp.ne.s32.totalorder %s19_s8, %s1823_s16  ;;  %p1829_p13 = scmp.lt.s32.totalorder %s1823_s16, %s1823_s16 }
  0x1d   :  { %p1830_p0 = por %p1829_p13, %p1828_p12 }
  0x1f   :  { %p1831_p1 = pnand %p1830_p0, %p1824_p11 }
  0x21   :  { %1834 = shalt.err (!%p1831_p1)
}
  0x22   :  { %s1889_s1 = smov 64   ;;  %s1890_s17 = smov 4  }
  0x23   :  { %24 = dma.hbm_to_vmem [thread:$0]  %s2171_s0, 128, %s19_s8, [#allocation5], %s1889_s1, %s1889_s1, %s1890_s17  }
  0x24   :  { %s1891_s20 = smov [#allocation9]   ;;  %s1835_s24 = scalar_lea.hbm %s2174_s3, 1024 }
  0x25   :  { %s44_s21 = sshll.u32 %s1891_s20, 4  ;;  %p1836_p2 = scmp.ne.s32.totalorder %s2174_s3, %s1835_s24  ;;  %s45_s21 = int_to_ptr.vmem [resolvable:$true] %s44_s21 }
  0x26   :  { %p1839_p3 = scmp.lt.u32.totalorder %s1835_s24, %s2174_s3 }
  0x28   :  { %p1841_p4 = pnand %p1839_p3, %p1836_p2 }
  0x2a   :  { %1844 = shalt.err (!%p1841_p4)
}
  0x2b   :  { %s1845_s29 = scalar_lea.vmem %s45_s21, 1024  ;;  %p1850_p6 = scmp.lt.s32.totalorder %s45_s21, %s45_s21 }
  0x2c   :  { %p1846_p5 = scmp.ne.s32.totalorder %s45_s21, %s1845_s29  ;;  %p1851_p7 = scmp.lt.s32.totalorder %s1845_s29, %s1845_s29 }
  0x2e   :  { %p1852_p8 = por %p1851_p7, %p1850_p6 }
  0x30   :  { %p1853_p9 = pnand %p1852_p8, %p1846_p5 }
  0x32   :  { %1856 = shalt.err (!%p1853_p9)
}
  0x33   :  { %50 = dma.hbm_to_vmem [thread:$0]  %s2174_s3, 1024, %s45_s21, [#allocation8], %s1889_s1, %s1889_s1, %s1890_s17  }
  0x34   :  { %1879 = dma.done.wait [#allocation5], 128  }
  0x35   :  { %1880 = vsyncadd [#allocation5], 4294967168 }
  0x36   :  { %1881 = dma.done.wait [#allocation8], 4096  }
  0x37   :  { %1882 = vsyncadd [#allocation8], 4294963200  ;;  %v1892_v0 = vmov 0   ;;  %v1893_v1 = vmov 0.0   ;;  %v1718_v2 = vld [vmem:[#allocation7 + $0x4] ss:$12 sps:$4 sm:$0xff]   ;;  %v99_v27 = vlaneseq }
  0x38   :  { %280 = vmatprep.mubr.bf16.mxu0 %v1892_v0  ;;  %1567 = vmatprep.subr.bf16.mxu1 %v1893_v1  ;;  %v1720_v3 = vld [vmem:[#allocation7] ss:$12 sps:$4 sm:$0xff]   ;;  %v1721_v4 = vld [vmem:[#allocation7 + $0x1c] ss:$12 sps:$4 sm:$0xff]   ;;  %v1723_v5 = vld [vmem:[#allocation7 + $0x18] ss:$12 sps:$4 sm:$0xff]  }
  0x39   :  { %248 = vmatprep.subr.bf16.mxu0 %v1718_v2  ;;  %v1724_v6 = vld [vmem:[#allocation7 + $0x34] ss:$12 sps:$4 sm:$0xff]   ;;  %v1726_v7 = vld [vmem:[#allocation7 + $0x30] ss:$12 sps:$4 sm:$0xff]   ;;  %v1727_v8 = vld [vmem:[#allocation7 + $0x4c] ss:$12 sps:$4 sm:$0xff]  }
  0x3a   :  { %249 = vmatpush1.bf16.msra.mxu0 %v1720_v3  ;;  %v1729_v9 = vld [vmem:[#allocation7 + $0x48] ss:$12 sps:$4 sm:$0xff]   ;;  %v1730_v10 = vld [vmem:[#allocation7 + $0x64] ss:$12 sps:$4 sm:$0xff]   ;;  %v1744_v12 = vld [vmem:[#allocation7 + $0x20] ss:$12 sps:$4 sm:$0xff]  }
  0x3b   :  { %250 = vmatprep.subr.bf16.mxu0 %v1721_v4  ;;  %v1743_v11 = vld [vmem:[#allocation7 + $0x8] ss:$12 sps:$4 sm:$0xff]   ;;  %v1732_v13 = vld [vmem:[#allocation7 + $0x60] ss:$12 sps:$4 sm:$0xff]   ;;  %v1745_v15 = vld [vmem:[#allocation7 + $0x38] ss:$12 sps:$4 sm:$0xff]  }
  0x3c   :  { %1568 = vmatpush3.bf16.msra.mxu1 %v1743_v11  ;;  %v1733_v14 = vld [vmem:[#allocation7 + $0x7c] ss:$12 sps:$4 sm:$0xff]   ;;  %v1735_v16 = vld [vmem:[#allocation7 + $0x78] ss:$12 sps:$4 sm:$0xff]   ;;  %v1736_v17 = vld [vmem:[#allocation7 + $0x94] ss:$12 sps:$4 sm:$0xff]  }
  0x3d   :  { %1569 = vmatprep.subr.bf16.mxu1 %v1893_v1  ;;  %v1746_v18 = vld [vmem:[#allocation7 + $0x50] ss:$12 sps:$4 sm:$0xff]   ;;  %v1739_v20 = vld [vmem:[#allocation7 + $0xac] ss:$12 sps:$4 sm:$0xff]   ;;  %v1747_v21 = vld [vmem:[#allocation7 + $0x68] ss:$12 sps:$4 sm:$0xff]  }
  0x3e   :  { %251 = vmatpush1.bf16.msra.mxu0 %v1723_v5  ;;  %v1738_v19 = vld [vmem:[#allocation7 + $0x90] ss:$12 sps:$4 sm:$0xff]   ;;  %v1741_v22 = vld [vmem:[#allocation7 + $0xa8] ss:$12 sps:$4 sm:$0xff]   ;;  %v1748_v24 = vld [vmem:[#allocation7 + $0x80] ss:$12 sps:$4 sm:$0xff]  }
  0x3f   :  { %252 = vmatprep.subr.bf16.mxu0 %v1724_v6  ;;  %v1742_v23 = vld [vmem:[#allocation4] sm:$0xff]   ;;  %vm1894_vm0 = vmmov 0   ;;  %v100_v28 = vshrl.u32 %v99_v27, 7  ;;  %v97_v30 = vld [vmem:[%s2173_s2] sm:$0x7]  ;;  %vm356_vm1 = vcmask 261120  }
  0x40   :  { %1570 = vmatpush3.bf16.msra.mxu1 %v1744_v12  ;;  %v1749_v25 = vld [vmem:[#allocation7 + $0x98] ss:$12 sps:$4 sm:$0xff]   ;;  %v1750_v26 = vld [vmem:[#allocation7 + $0xb0] ss:$12 sps:$4 sm:$0xff]   ;;  %1583 = vmatprep.mubr.msk.bf16.mxu1 %vm1894_vm0, %v1893_v1  ;;  %vm477_vm2 = vcmask 1043456   ;;  %vm449_vm3 = vcmask 64512  }
  0x41   :  { %1571 = vmatprep.subr.bf16.mxu1 %v1893_v1  ;;  %v105_v29 = vsub.s32 1, %v100_v28  ;;  %v101_v32 = vsub.s32 0, %v100_v28  ;;  %v109_v48 = vsub.s32 2, %v100_v28  ;;  %s1895_s2 = smov 96   ;;  %s1896_s7 = smov 32   ;;  %vm812_vm4 = vcmask 523520  }
  0x42   :  { %253 = vmatpush1.bf16.msra.mxu0 %v1726_v7  ;;  %vm1057_vm5 = vcmask 785920   ;;  %vm1302_vm6 = vcmask 1048320   ;;  %s1897_s10 = smov [#allocation10]  }
  0x43   :  { %254 = vmatprep.subr.bf16.mxu0 %v1727_v8  ;;  %v106_v31 = vrot.slane %v97_v30, %v105_v29  ;;  %v102_v38 = vrot.slane %v97_v30, %v101_v32  ;;  %v110_v49 = vrot.slane %v97_v30, %v109_v48  ;;  %s1424_s11 = sshll.u32 %s1897_s10, 4  ;;  %s1425_s11 = int_to_ptr.vmem [resolvable:$true] %s1424_s11 }
  0x44   :  { %1572 = vmatpush3.bf16.msra.mxu1 %v1745_v15  ;;  %s1857_s12 = scalar_lea.vmem %s1425_s11, 256  ;;  %p1862_p11 = scmp.lt.s32.totalorder %s1425_s11, %s1425_s11 }
  0x45   :  { %1573 = vmatprep.subr.bf16.mxu1 %v1893_v1  ;;  %p1858_p10 = scmp.ne.s32.totalorder %s1425_s11, %s1857_s12  ;;  %p1863_p12 = scmp.lt.s32.totalorder %s1857_s12, %s1857_s12 }
  0x46   :  { %255 = vmatpush1.bf16.msra.mxu0 %v1729_v9 }
  0x47   :  { %256 = vmatprep.subr.bf16.mxu0 %v1730_v10  ;;  %p1864_p13 = por %p1863_p12, %p1862_p11 }
  0x48   :  { %1574 = vmatpush3.bf16.msra.mxu1 %v1746_v18 }
  0x49   :  { %1575 = vmatprep.subr.bf16.mxu1 %v1893_v1  ;;  %p1865_p0 = pnand %p1864_p13, %p1858_p10 }
  0x4a   :  { %257 = vmatpush1.bf16.msra.mxu0 %v1732_v13 }
  0x4b   :  { %258 = vmatprep.subr.bf16.mxu0 %v1733_v14 }
  0x4c   :  { %1576 = vmatpush3.bf16.msra.mxu1 %v1747_v21 }
  0x4d   :  { %1577 = vmatprep.subr.bf16.mxu1 %v1893_v1 }
  0x4e   :  { %259 = vmatpush1.bf16.msra.mxu0 %v1735_v16 }
  0x4f   :  { %260 = vmatprep.subr.bf16.mxu0 %v1736_v17 }
  0x50   :  { %1578 = vmatpush3.bf16.msra.mxu1 %v1748_v24 }
  0x51   :  { %1579 = vmatprep.subr.bf16.mxu1 %v1893_v1 }
  0x52   :  { %261 = vmatpush1.bf16.msra.mxu0 %v1738_v19 }
  0x53   :  { %262 = vmatprep.subr.bf16.mxu0 %v1739_v20 }
  0x54   :  { %1580 = vmatpush3.bf16.msra.mxu1 %v1749_v25 }
  0x55   :  { %1581 = vmatprep.subr.bf16.mxu1 %v1893_v1 }
  0x56   :  { %263 = vmatpush1.bf16.msra.mxu0 %v1741_v22 }
  0x57   :  { %1611 = vmatprep.subr.bf16.mxu0 %v1893_v1 }
  0x58   :  { %1582 = vmatpush3.bf16.msra.mxu1 %v1750_v26 }
  0x59   :  { %281 = vmatmul.mubr.bf16.vlgmr.msra.gmra.mrb[0].mxu0 %v1742_v23  ;;  %1587 = vmatprep.subr.bf16.mxu1 %v1893_v1 }
  0x5a   :  { %1613 = vmatprep.mubr.msk.bf16.mxu0 %vm1894_vm0, %v1893_v1 }
  0x5b   :  { %1584 = vmatmul.mubr.bf16.vlgmr.msra.gmra.mrb[0].mxu1 %v1742_v23 }
  0x5c   :  { %1589 = vmatprep.mubr.msk.bf16.mxu1 %vm1894_vm0, %v1893_v1 }
 0x12c   :  { %v282_v33 = vpop.f32.mrb[0].mxu0 }
 0x12d   :  { %v284_v34 = vpop.f32.mrb[1].mxu0  ;;  %v283_v42 = vadd.f32 %v282_v33, %v102_v38 }
 0x12e   :  { %v285_v35 = vadd.f32 %v284_v34, %v106_v31  ;;  %v286_v36 = vpop.f32.mrb[2].mxu0  ;;  %v325_v50 = vpop.f32.mrb[0].mxu1 }
 0x12f   :  { %v288_v37 = vpop.f32.mrb[3].mxu0  ;;  %v1996_v44 = vpack.c.bf16 %v283_v42, %v283_v42  ;;  %v287_v46 = vadd.f32 %v286_v36, %v102_v38  ;;  %v326_v51 = vadd.f32 %v325_v50, %v110_v49  ;;  %v1585_v52 = vpop.f32.mrb[1].mxu1 }
 0x130   :  { %v1989_v39 = vpack.c.bf16 %v285_v35, %v285_v35  ;;  %v289_v40 = vadd.f32 %v288_v37, %v106_v31  ;;  %v328_v53 = vpop.f32.mrb[2].mxu1 }
 0x131   :  { %v2005_v47 = vpack.c.bf16 %v287_v46, %v287_v46  ;;  %v2011_v54 = vpack.c.bf16 %v326_v51, %v326_v51  ;;  %v329_v55 = vadd.f32 %v328_v53, %v110_v49  ;;  %v1586_v56 = vpop.f32.mrb[3].mxu1 }
 0x132   :  { %v361_v41 = vsel %vm356_vm1, %v1989_v39, 0  ;;  %v1994_v43 = vpack.c.bf16 %v289_v40, %v289_v40 }
 0x133   :  { %1588 = vmatpush3.bf16.xpose.msra.mxu1 %v361_v41  ;;  %v479_v57 = vsel %vm477_vm2, %v2011_v54, 0  ;;  %v2030_v19 = vpack.c.bf16 %v329_v55, %v329_v55 }
 0x134   :  { %1593 = vmatprep.subr.bf16.mxu1 %v1893_v1  ;;  %v407_v45 = vsel %vm356_vm1, %v1994_v43, 0 }
 0x135   :  { %v525_v22 = vsel %vm477_vm2, %v2030_v19, 0 }
 0x13a   :  { %1590 = vmatmul.mubr.msk.bf16.vlgmr.msra.gmra.mrb[4].mxu1 %vm356_vm1, %v1996_v44 }
 0x13b   :  { %1594 = vmatpush3.bf16.xpose.msra.mxu1 %v407_v45  ;;  %1595 = vmatprep.mubr.msk.bf16.mxu1 %vm1894_vm0, %v1893_v1 }
 0x13c   :  { %1599 = vmatprep.subr.bf16.mxu1 %v1893_v1 }
 0x142   :  { %1596 = vmatmul.mubr.msk.bf16.vlgmr.msra.gmra.mrb[8].mxu1 %vm356_vm1, %v2005_v47 }
 0x143   :  { %1601 = vmatprep.mubr.msk.bf16.mxu1 %vm1894_vm0, %v1893_v1  ;;  %1600 = vmatpush3.bf16.msra.mxu1 %v479_v57 }
 0x144   :  { %1605 = vmatprep.subr.bf16.mxu1 %v1893_v1 }
 0x20d   :  { %v397_v58 = vpop.f32.mrb[4].mxu1 }
 0x20e   :  { %v1591_v59 = vpop.f32.mrb[5].mxu1  ;;  %v450_v60 = vsel %vm449_vm3, %v397_v58, -inf }
 0x20f   :  { %451 = vmax.xlane.f32.xlu0 %v450_v60  ;;  %v400_v61 = vpop.f32.mrb[6].mxu1 }
 0x210   :  { %v1592_v62 = vpop.f32.mrb[7].mxu1 }
 0x215   :  { %v443_v63 = vpop.f32.mrb[8].mxu1 }
 0x216   :  { %v1597_v0 = vpop.f32.mrb[9].mxu1  ;;  %v453_v2 = vsel %vm449_vm3, %v443_v63, -inf }
 0x217   :  { %454 = vmax.xlane.f32.xlu0 %v453_v2  ;;  %v446_v3 = vpop.f32.mrb[10].mxu1 }
 0x218   :  { %v1598_v4 = vpop.f32.mrb[11].mxu1 }
 0x22d   :  { %585 = vrot.lane.b32.xlu0 %v1989_v39, %s1895_s2 }
 0x29c   :  { %v452_v5 = vpop.xlane.xlu0 %451 }
 0x29d   :  { %v456_v6 = vsub.f32 %v397_v58, %v452_v5 }
 0x29f   :  { %v458_v7 = vmul.f32 1.442695, %v456_v6 }
 0x2a1   :  { %1759 = vpow2.f32 %v458_v7 }
 0x2a4   :  { %v455_v8 = vpop.xlane.xlu0 %454 }
 0x2a5   :  { %v457_v13 = vsub.f32 %v443_v63, %v455_v8 }
 0x2a7   :  { %v460_v14 = vmul.f32 1.442695, %v457_v13 }
 0x2a8   :  { %v586_v9 = vpop.permute.xlu0 %585 }
 0x2a9   :  { %v591_v10 = vsel %vm356_vm1, %v586_v9, 0  ;;  %1761 = vpow2.f32 %v460_v14 }
 0x2aa   :  { %1612 = vmatpush3.bf16.xpose.msra.mxu0 %v591_v10 }
 0x2ab   :  { %v1760_v11 = vpop.eup %1759  ;;  %1623 = vmatprep.subr.bf16.mxu0 %v1893_v1 }
 0x2ac   :  { %v462_v12 = vsel %vm449_vm3, %v1760_v11, 0.0 }
 0x2ad   :  { %463 = vadd.xlane.f32.xlu1 %v462_v12 }
 0x2b3   :  { %v1762_v15 = vpop.eup %1761 }
 0x2b4   :  { %v465_v16 = vsel %vm449_vm3, %v1762_v15, 0.0 }
 0x2be   :  { %637 = vrot.lane.b32.xlu1 %v1994_v43, %s1895_s2 }
 0x2e2   :  { %466 = vadd.xlane.f32.xlu1 %v465_v16 }
 0x2f3   :  { %582 = vrot.lane.b32.xlu1 %v1996_v44, %s1895_s2 }
 0x2f7   :  { %634 = vrot.lane.b32.xlu1 %v2005_v47, %s1895_s2 }
 0x33a   :  { %v464_v17 = vpop.xlane.xlu1 %463 }
 0x33b   :  { %1763 = vrcp.f32 %v464_v17 }
 0x33e   :  { %v638_v23 = vpop.permute.xlu1 %637 }
 0x33f   :  { %v643_v29 = vsel %vm356_vm1, %v638_v23, 0 }
 0x345   :  { %v1764_v18 = vpop.eup %1763 }
 0x346   :  { %v470_v20 = vmul.f32 %v1764_v18, %v1760_v11 }
 0x348   :  { %v472_v21 = vpack.c.bf16 %v470_v20, %v470_v20 }
 0x34a   :  { %1602 = vmatmul.mubr.msk.bf16.vlgmr.msra.gmra.mrb[12].mxu1 %vm449_vm3, %v472_v21 }
 0x34b   :  { %1606 = vmatpush3.bf16.msra.mxu1 %v525_v22  ;;  %1607 = vmatprep.mubr.msk.bf16.mxu1 %vm1894_vm0, %v1893_v1 }
 0x34c   :  { %1617 = vmatprep.subr.bf16.mxu1 %v1893_v1 }
 0x36f   :  { %v467_v24 = vpop.xlane.xlu1 %466 }
 0x370   :  { %1765 = vrcp.f32 %v467_v24 }
 0x373   :  { %v583_v25 = vpop.permute.xlu1 %582 }
 0x374   :  { %1614 = vmatmul.mubr.msk.bf16.vlgmr.msra.gmra.mrb[4].mxu0 %vm356_vm1, %v583_v25 }
 0x375   :  { %1625 = vmatprep.mubr.msk.bf16.mxu0 %vm1894_vm0, %v1893_v1 }
 0x377   :  { %v635_v30 = vpop.permute.xlu1 %634 }
 0x37a   :  { %v1766_v26 = vpop.eup %1765 }
 0x37b   :  { %v471_v27 = vmul.f32 %v1766_v26, %v1762_v15 }
 0x37d   :  { %v473_v28 = vpack.c.bf16 %v471_v27, %v471_v27 }
 0x37f   :  { %1608 = vmatmul.mubr.msk.bf16.vlgmr.msra.gmra.mrb[16].mxu1 %vm449_vm3, %v473_v28 }
 0x380   :  { %1618 = vmatpush3.bf16.xpose.msra.mxu1 %v643_v29  ;;  %1619 = vmatprep.mubr.msk.bf16.mxu1 %vm1894_vm0, %v1893_v1 }
 0x381   :  { %1629 = vmatprep.subr.bf16.mxu1 %v1893_v1 }
 0x387   :  { %1620 = vmatmul.mubr.msk.bf16.vlgmr.msra.gmra.mrb[20].mxu1 %vm356_vm1, %v635_v30 }
 0x388   :  { %1631 = vmatprep.mubr.msk.bf16.mxu1 %vm1894_vm0, %v1893_v1 }
 0x41d   :  { %v515_v31 = vpop.f32.mrb[12].mxu1 }
 0x41e   :  { %v1603_v32 = vpop.f32.mrb[13].mxu1 }
 0x41f   :  { %v518_v33 = vpop.f32.mrb[14].mxu1 }
 0x420   :  { %v1604_v34 = vpop.f32.mrb[15].mxu1 }
 0x447   :  { %v627_v35 = vpop.f32.mrb[4].mxu0 }
 0x448   :  { %v1615_v36 = vpop.f32.mrb[5].mxu0  ;;  %v685_v37 = vsel %vm449_vm3, %v627_v35, -inf }
 0x449   :  { %686 = vmax.xlane.f32.xlu0 %v685_v37  ;;  %v630_v38 = vpop.f32.mrb[6].mxu0 }
 0x44a   :  { %v1616_v40 = vpop.f32.mrb[7].mxu0 }
 0x452   :  { %v561_v41 = vpop.f32.mrb[16].mxu1 }
 0x453   :  { %v567_v42 = vpack.c.bf16 %v561_v41, %v515_v31  ;;  %v1609_v45 = vpop.f32.mrb[17].mxu1 }
 0x454   :  { %v564_v46 = vpop.f32.mrb[18].mxu1 }
 0x455   :  { %568 = vst.msk [vmem:[#allocation3] sm:$0xff] %vm356_vm1, %v567_v42  ;;  %v1610_v48 = vpop.f32.mrb[19].mxu1 }
 0x45a   :  { %v679_v49 = vpop.f32.mrb[20].mxu1 }
 0x45b   :  { %v1621_v50 = vpop.f32.mrb[21].mxu1  ;;  %v688_v51 = vsel %vm449_vm3, %v679_v49, -inf }
 0x45c   :  { %689 = vmax.xlane.f32.xlu1 %v688_v51  ;;  %v682_v52 = vpop.f32.mrb[22].mxu1 }
 0x45d   :  { %v1622_v53 = vpop.f32.mrb[23].mxu1 }
 0x46d   :  { %759 = vrot.lane.b32.xlu1 %v2030_v19, %s1895_s2 }
 0x471   :  { %830 = vrot.lane.b32.xlu1 %v1989_v39, %s1889_s1 }
 0x475   :  { %882 = vrot.lane.b32.xlu1 %v1994_v43, %s1889_s1 }
 0x479   :  { %879 = vrot.lane.b32.xlu1 %v2005_v47, %s1889_s1 }
 0x4d6   :  { %v687_v55 = vpop.xlane.xlu0 %686 }
 0x4d7   :  { %v691_v56 = vsub.f32 %v627_v35, %v687_v55 }
 0x4d9   :  { %v693_v57 = vmul.f32 1.442695, %v691_v56 }
 0x4db   :  { %1767 = vpow2.f32 %v693_v57 }
 0x4e5   :  { %v1768_v58 = vpop.eup %1767 }
 0x4e6   :  { %v697_v59 = vsel %vm449_vm3, %v1768_v58, 0.0 }
 0x4e7   :  { %698 = vadd.xlane.f32.xlu0 %v697_v59 }
 0x4e9   :  { %v690_v60 = vpop.xlane.xlu1 %689 }
 0x4ea   :  { %v692_v61 = vsub.f32 %v679_v49, %v690_v60 }
 0x4ec   :  { %v695_v62 = vmul.f32 1.442695, %v692_v61 }
 0x4ed   :  { %v760_v63 = vpop.permute.xlu1 %759 }
 0x4ee   :  { %1769 = vpow2.f32 %v695_v62  ;;  %v765_v0 = vsel %vm477_vm2, %v760_v63, 0 }
 0x4ef   :  { %1630 = vmatpush3.bf16.msra.mxu1 %v765_v0 }
 0x4f0   :  { %1641 = vmatprep.subr.bf16.mxu1 %v1893_v1 }
 0x4f1   :  { %v831_v10 = vpop.permute.xlu1 %830 }
 0x4f2   :  { %v836_v15 = vsel %vm356_vm1, %v831_v10, 0 }
 0x4f5   :  { %v883_v14 = vpop.permute.xlu1 %882 }
 0x4f6   :  { %v888_v17 = vsel %vm356_vm1, %v883_v14, 0 }
 0x4f8   :  { %v1770_v2 = vpop.eup %1769 }
 0x4f9   :  { %v700_v3 = vsel %vm449_vm3, %v1770_v2, 0.0  ;;  %v880_v20 = vpop.permute.xlu1 %879 }
 0x4fa   :  { %701 = vadd.xlane.f32.xlu0 %v700_v3 }
 0x510   :  { %710 = vrot.lane.b32.xlu0 %v2011_v54, %s1895_s2 }
 0x514   :  { %827 = vrot.lane.b32.xlu0 %v1996_v44, %s1889_s1 }
 0x574   :  { %v699_v4 = vpop.xlane.xlu0 %698 }
 0x575   :  { %1771 = vrcp.f32 %v699_v4 }
 0x57f   :  { %v1772_v5 = vpop.eup %1771 }
 0x580   :  { %v705_v7 = vmul.f32 %v1772_v5, %v1768_v58 }
 0x582   :  { %v707_v11 = vpack.c.bf16 %v705_v7, %v705_v7 }
 0x587   :  { %v702_v6 = vpop.xlane.xlu0 %701 }
 0x588   :  { %1773 = vrcp.f32 %v702_v6 }
 0x58b   :  { %v711_v8 = vpop.permute.xlu0 %710 }
 0x58c   :  { %v716_v9 = vsel %vm477_vm2, %v711_v8, 0 }
 0x58d   :  { %1624 = vmatpush3.bf16.msra.mxu0 %v716_v9 }
 0x58e   :  { %1635 = vmatprep.subr.bf16.mxu0 %v1893_v1 }
 0x58f   :  { %v828_v18 = vpop.permute.xlu0 %827 }
 0x590   :  { %1626 = vmatmul.mubr.msk.bf16.vlgmr.msra.gmra.mrb[8].mxu0 %vm449_vm3, %v707_v11 }
 0x591   :  { %1637 = vmatprep.mubr.msk.bf16.mxu0 %vm1894_vm0, %v1893_v1 }
 0x592   :  { %v1774_v12 = vpop.eup %1773 }
 0x593   :  { %v706_v13 = vmul.f32 %v1774_v12, %v1770_v2 }
 0x595   :  { %v708_v16 = vpack.c.bf16 %v706_v13, %v706_v13 }
 0x596   :  { %1636 = vmatpush3.bf16.xpose.msra.mxu0 %v836_v15 }
 0x597   :  { %1632 = vmatmul.mubr.msk.bf16.vlgmr.msra.gmra.mrb[24].mxu1 %vm449_vm3, %v708_v16  ;;  %1647 = vmatprep.subr.bf16.mxu0 %v1893_v1 }
 0x598   :  { %1642 = vmatpush3.bf16.xpose.msra.mxu1 %v888_v17  ;;  %1643 = vmatprep.mubr.msk.bf16.mxu1 %vm1894_vm0, %v1893_v1 }
 0x599   :  { %1653 = vmatprep.subr.bf16.mxu1 %v1893_v1 }
 0x59d   :  { %1638 = vmatmul.mubr.msk.bf16.vlgmr.msra.gmra.mrb[12].mxu0 %vm356_vm1, %v828_v18 }
 0x59e   :  { %1649 = vmatprep.mubr.msk.bf16.mxu0 %vm1894_vm0, %v1893_v1 }
 0x59f   :  { %1644 = vmatmul.mubr.msk.bf16.vlgmr.msra.gmra.mrb[28].mxu1 %vm356_vm1, %v880_v20 }
 0x5a0   :  { %1655 = vmatprep.mubr.msk.bf16.mxu1 %vm1894_vm0, %v1893_v1 }
 0x663   :  { %v2086_v21 = vpop.f32.mrb[8].mxu0 }
 0x664   :  { %v1627_v22 = vpop.f32.mrb[9].mxu0 }
 0x665   :  { %v755_v23 = vpop.f32.mrb[10].mxu0 }
 0x666   :  { %v1628_v24 = vpop.f32.mrb[11].mxu0 }
 0x66a   :  { %v2088_v25 = vpop.f32.mrb[24].mxu1 }
 0x66b   :  { %v807_v26 = vpack.c.bf16 %v2088_v25, %v2086_v21  ;;  %v1633_v27 = vpop.f32.mrb[25].mxu1 }
 0x66c   :  { %v804_v28 = vpop.f32.mrb[26].mxu1 }
 0x66d   :  { %v1634_v29 = vpop.f32.mrb[27].mxu1 }
 0x670   :  { %v872_v30 = vpop.f32.mrb[12].mxu0 }
 0x671   :  { %v1639_v31 = vpop.f32.mrb[13].mxu0  ;;  %v930_v32 = vsel %vm449_vm3, %v872_v30, -inf }
 0x672   :  { %931 = vmax.xlane.f32.xlu0 %v930_v32  ;;  %v875_v33 = vpop.f32.mrb[14].mxu0  ;;  %v924_v34 = vpop.f32.mrb[28].mxu1 }
 0x673   :  { %v1640_v35 = vpop.f32.mrb[15].mxu0  ;;  %v1645_v36 = vpop.f32.mrb[29].mxu1  ;;  %v933_v37 = vsel %vm449_vm3, %v924_v34, -inf }
 0x674   :  { %934 = vmax.xlane.f32.xlu1 %v933_v37  ;;  %v927_v38 = vpop.f32.mrb[30].mxu1 }
 0x675   :  { %v1646_v40 = vpop.f32.mrb[31].mxu1 }
 0x685   :  { %1004 = vrot.lane.b32.xlu1 %v2030_v19, %s1889_s1 }
 0x689   :  { %1075 = vrot.lane.b32.xlu1 %v1989_v39, %s1896_s7 }
 0x68d   :  { %1127 = vrot.lane.b32.xlu1 %v1994_v43, %s1896_s7 }
 0x691   :  { %1124 = vrot.lane.b32.xlu1 %v2005_v47, %s1896_s7 }
 0x6ff   :  { %v932_v41 = vpop.xlane.xlu0 %931 }
 0x700   :  { %v936_v42 = vsub.f32 %v872_v30, %v932_v41 }
 0x701   :  { %v935_v45 = vpop.xlane.xlu1 %934 }
 0x702   :  { %v938_v46 = vmul.f32 1.442695, %v936_v42  ;;  %v937_v48 = vsub.f32 %v924_v34, %v935_v45 }
 0x704   :  { %1775 = vpow2.f32 %v938_v46  ;;  %v940_v49 = vmul.f32 1.442695, %v937_v48 }
 0x705   :  { %v1005_v50 = vpop.permute.xlu1 %1004 }
 0x706   :  { %1777 = vpow2.f32 %v940_v49  ;;  %v1010_v51 = vsel %vm477_vm2, %v1005_v50, 0 }
 0x707   :  { %1654 = vmatpush3.bf16.msra.mxu1 %v1010_v51 }
 0x708   :  { %1665 = vmatprep.subr.bf16.mxu1 %v1893_v1 }
 0x709   :  { %v1076_v59 = vpop.permute.xlu1 %1075 }
 0x70d   :  { %v1128_v0 = vpop.permute.xlu1 %1127 }
 0x70e   :  { %v1776_v39 = vpop.eup %1775  ;;  %v1133_v3 = vsel %vm356_vm1, %v1128_v0, 0 }
 0x70f   :  { %v942_v43 = vsel %vm449_vm3, %v1776_v39, 0.0 }
 0x710   :  { %v1778_v52 = vpop.eup %1777  ;;  %943 = vadd.xlane.f32.xlu0 %v942_v43  ;;  %v1752_v43 = vld [vmem:[#allocation9 + $0x8] sm:$0xff]  }
 0x711   :  { %v945_v47 = vsel %vm449_vm3, %v1778_v52, 0.0  ;;  %v1125_v5 = vpop.permute.xlu1 %1124 }
 0x714   :  { %946 = vadd.xlane.f32.xlu0 %v945_v47  ;;  %v1754_v47 = vld [vmem:[#allocation9 + $0x18] sm:$0xff]  }
 0x72a   :  { %955 = vrot.lane.b32.xlu0 %v2011_v54, %s1889_s1 }
 0x72e   :  { %1072 = vrot.lane.b32.xlu0 %v1996_v44, %s1896_s7  ;;  %v1081_v44 = vsel %vm356_vm1, %v1076_v59, 0 }
 0x79d   :  { %v944_v53 = vpop.xlane.xlu0 %943 }
 0x79e   :  { %1779 = vrcp.f32 %v944_v53  ;;  %v1755_v53 = vld [vmem:[#allocation9 + $0x20] sm:$0xff]  }
 0x7a1   :  { %v947_v55 = vpop.xlane.xlu0 %946 }
 0x7a2   :  { %1781 = vrcp.f32 %v947_v55  ;;  %v1756_v55 = vld [vmem:[#allocation9 + $0x28] sm:$0xff]  }
 0x7a5   :  { %v956_v56 = vpop.permute.xlu0 %955 }
 0x7a6   :  { %v961_v57 = vsel %vm477_vm2, %v956_v56, 0  ;;  %v1757_v56 = vld [vmem:[#allocation9 + $0x30] sm:$0xff]  }
 0x7a7   :  { %1648 = vmatpush3.bf16.msra.mxu0 %v961_v57  ;;  %v1758_v57 = vld [vmem:[#allocation9 + $0x38] sm:$0xff]  }
 0x7a8   :  { %v1780_v58 = vpop.eup %1779  ;;  %1659 = vmatprep.subr.bf16.mxu0 %v1893_v1 }
 0x7a9   :  { %v950_v60 = vmul.f32 %v1780_v58, %v1776_v39  ;;  %v1073_v4 = vpop.permute.xlu0 %1072  ;;  %v1751_v39 = vld [vmem:[#allocation9] sm:$0xff]  }
 0x7ab   :  { %v952_v61 = vpack.c.bf16 %v950_v60, %v950_v60 }
 0x7ac   :  { %v1782_v62 = vpop.eup %1781 }
 0x7ad   :  { %v951_v63 = vmul.f32 %v1782_v62, %v1778_v52  ;;  %1650 = vmatmul.mubr.msk.bf16.vlgmr.msra.gmra.mrb[16].mxu0 %vm449_vm3, %v952_v61  ;;  %v1753_v52 = vld [vmem:[#allocation9 + $0x10] sm:$0xff]  }
 0x7ae   :  { %1661 = vmatprep.mubr.msk.bf16.mxu0 %vm1894_vm0, %v1893_v1 }
 0x7af   :  { %v953_v2 = vpack.c.bf16 %v951_v63, %v951_v63 }
 0x7b0   :  { %1660 = vmatpush3.bf16.xpose.msra.mxu0 %v1081_v44 }
 0x7b1   :  { %1656 = vmatmul.mubr.msk.bf16.vlgmr.msra.gmra.mrb[32].mxu1 %vm449_vm3, %v953_v2  ;;  %1671 = vmatprep.subr.bf16.mxu0 %v1893_v1 }
 0x7b2   :  { %1666 = vmatpush3.bf16.xpose.msra.mxu1 %v1133_v3  ;;  %1667 = vmatprep.mubr.msk.bf16.mxu1 %vm1894_vm0, %v1893_v1 }
 0x7b3   :  { %1677 = vmatprep.subr.bf16.mxu1 %v1893_v1 }
 0x7b7   :  { %1662 = vmatmul.mubr.msk.bf16.vlgmr.msra.gmra.mrb[20].mxu0 %vm356_vm1, %v1073_v4 }
 0x7b8   :  { %1673 = vmatprep.mubr.msk.bf16.mxu0 %vm1894_vm0, %v1893_v1 }
 0x7b9   :  { %1668 = vmatmul.mubr.msk.bf16.vlgmr.msra.gmra.mrb[36].mxu1 %vm356_vm1, %v1125_v5 }
 0x7ba   :  { %1679 = vmatprep.mubr.msk.bf16.mxu1 %vm1894_vm0, %v1893_v1 }
 0x880   :  { %v997_v6 = vpop.f32.mrb[16].mxu0 }
 0x881   :  { %v1651_v7 = vpop.f32.mrb[17].mxu0 }
 0x882   :  { %v1000_v8 = vpop.f32.mrb[18].mxu0 }
 0x883   :  { %v1652_v9 = vpop.f32.mrb[19].mxu0 }
 0x884   :  { %v1046_v10 = vpop.f32.mrb[32].mxu1 }
 0x885   :  { %v1052_v11 = vpack.c.bf16 %v1046_v10, %v997_v6  ;;  %v1657_v12 = vpop.f32.mrb[33].mxu1 }
 0x886   :  { %v1049_v13 = vpop.f32.mrb[34].mxu1 }
 0x887   :  { %v1658_v14 = vpop.f32.mrb[35].mxu1 }
 0x88a   :  { %v1117_v15 = vpop.f32.mrb[20].mxu0 }
 0x88b   :  { %v1663_v16 = vpop.f32.mrb[21].mxu0  ;;  %v1175_v17 = vsel %vm449_vm3, %v1117_v15, -inf }
 0x88c   :  { %1176 = vmax.xlane.f32.xlu0 %v1175_v17  ;;  %v1120_v18 = vpop.f32.mrb[22].mxu0  ;;  %v1169_v20 = vpop.f32.mrb[36].mxu1 }
 0x88d   :  { %v1664_v22 = vpop.f32.mrb[23].mxu0  ;;  %v1669_v23 = vpop.f32.mrb[37].mxu1  ;;  %v1178_v24 = vsel %vm449_vm3, %v1169_v20, -inf }
 0x88e   :  { %1179 = vmax.xlane.f32.xlu1 %v1178_v24  ;;  %v1172_v27 = vpop.f32.mrb[38].mxu1 }
 0x88f   :  { %v1670_v28 = vpop.f32.mrb[39].mxu1 }
 0x89f   :  { %1249 = vrot.lane.b32.xlu1 %v2030_v19, %s1896_s7 }
 0x8a3   :  { %809 = vrot.lane.b32.xlu1 %v807_v26, %s1896_s7 }
 0x8a7   :  { %1054 = vrot.lane.b32.xlu1 %v1052_v11, %s1889_s1 }
 0x919   :  { %v1177_v29 = vpop.xlane.xlu0 %1176 }
 0x91a   :  { %v1181_v30 = vsub.f32 %v1117_v15, %v1177_v29 }
 0x91b   :  { %v1180_v31 = vpop.xlane.xlu1 %1179 }
 0x91c   :  { %v1183_v32 = vmul.f32 1.442695, %v1181_v30  ;;  %v1182_v33 = vsub.f32 %v1169_v20, %v1180_v31 }
 0x91e   :  { %1783 = vpow2.f32 %v1183_v32  ;;  %v1185_v34 = vmul.f32 1.442695, %v1182_v33 }
 0x91f   :  { %v1250_v35 = vpop.permute.xlu1 %1249 }
 0x920   :  { %1785 = vpow2.f32 %v1185_v34  ;;  %v1255_v36 = vsel %vm477_vm2, %v1250_v35, 0 }
 0x921   :  { %1678 = vmatpush3.bf16.msra.mxu1 %v1255_v36 }
 0x923   :  { %v810_v19 = vpop.permute.xlu1 %809 }
 0x924   :  { %813 = vst.msk [vmem:[#allocation3] sm:$0xff] %vm812_vm4, %v810_v19 }
 0x927   :  { %v1055_v21 = vpop.permute.xlu1 %1054 }
 0x928   :  { %v1784_v25 = vpop.eup %1783  ;;  %1058 = vst.msk [vmem:[#allocation3] sm:$0xff] %vm1057_vm5, %v1055_v21 }
 0x929   :  { %v1187_v26 = vsel %vm449_vm3, %v1784_v25, 0.0 }
 0x92a   :  { %v1786_v37 = vpop.eup %1785  ;;  %1188 = vadd.xlane.f32.xlu0 %v1187_v26 }
 0x92b   :  { %v1190_v38 = vsel %vm449_vm3, %v1786_v37, 0.0 }
 0x92e   :  { %1191 = vadd.xlane.f32.xlu0 %v1190_v38 }
 0x944   :  { %1200 = vrot.lane.b32.xlu0 %v2011_v54, %s1896_s7 }
 0x9b7   :  { %v1189_v40 = vpop.xlane.xlu0 %1188 }
 0x9b8   :  { %1787 = vrcp.f32 %v1189_v40 }
 0x9bb   :  { %v1192_v41 = vpop.xlane.xlu0 %1191 }
 0x9bc   :  { %1789 = vrcp.f32 %v1192_v41 }
 0x9bf   :  { %v1201_v42 = vpop.permute.xlu0 %1200 }
 0x9c0   :  { %v1206_v45 = vsel %vm477_vm2, %v1201_v42, 0 }
 0x9c1   :  { %1672 = vmatpush3.bf16.msra.mxu0 %v1206_v45 }
 0x9c2   :  { %v1788_v46 = vpop.eup %1787  ;;  %1683 = vmatprep.subr.bf16.mxu0 %v1893_v1 }
 0x9c3   :  { %v1195_v48 = vmul.f32 %v1788_v46, %v1784_v25 }
 0x9c5   :  { %v1197_v49 = vpack.c.bf16 %v1195_v48, %v1195_v48 }
 0x9c6   :  { %v1790_v50 = vpop.eup %1789 }
 0x9c7   :  { %v1196_v51 = vmul.f32 %v1790_v50, %v1786_v37  ;;  %1674 = vmatmul.mubr.msk.bf16.vlgmr.msra.gmra.mrb[24].mxu0 %vm449_vm3, %v1197_v49 }
 0x9c8   :  { %1699 = vmatprep.mubr.msk.bf16.mxu0 %vm1894_vm0, %v1893_v1  ;;  %1684 = vmatpush3.bf16.msra.mxu0 %v1751_v39 }
 0x9c9   :  { %v1198_v54 = vpack.c.bf16 %v1196_v51, %v1196_v51  ;;  %1685 = vmatprep.subr.bf16.mxu0 %v1893_v1 }
 0x9cb   :  { %1680 = vmatmul.mubr.msk.bf16.vlgmr.msra.gmra.mrb[40].mxu1 %vm449_vm3, %v1198_v54 }
 0x9cc   :  { %1686 = vmatpush3.bf16.msra.mxu0 %v1752_v43 }
 0x9cd   :  { %1687 = vmatprep.subr.bf16.mxu0 %v1893_v1 }
 0x9d0   :  { %1688 = vmatpush3.bf16.msra.mxu0 %v1753_v52 }
 0x9d1   :  { %1689 = vmatprep.subr.bf16.mxu0 %v1893_v1 }
 0x9d4   :  { %1690 = vmatpush3.bf16.msra.mxu0 %v1754_v47 }
 0x9d5   :  { %1691 = vmatprep.subr.bf16.mxu0 %v1893_v1 }
 0x9d8   :  { %1692 = vmatpush3.bf16.msra.mxu0 %v1755_v53 }
 0x9d9   :  { %1693 = vmatprep.subr.bf16.mxu0 %v1893_v1 }
 0x9dc   :  { %1694 = vmatpush3.bf16.msra.mxu0 %v1756_v55 }
 0x9dd   :  { %1695 = vmatprep.subr.bf16.mxu0 %v1893_v1 }
 0x9e0   :  { %1696 = vmatpush3.bf16.msra.mxu0 %v1757_v56 }
 0x9e1   :  { %1697 = vmatprep.subr.bf16.mxu0 %v1893_v1  ;;  %v1502_v1 = vld [vmem:[%s2175_s4] ss:$0 sm:$0xff] }
 0x9e4   :  { %1698 = vmatpush3.bf16.msra.mxu0 %v1758_v57 }
 0xa9a   :  { %v1242_v58 = vpop.f32.mrb[24].mxu0 }
 0xa9b   :  { %v1675_v59 = vpop.f32.mrb[25].mxu0 }
 0xa9c   :  { %v1245_v60 = vpop.f32.mrb[26].mxu0 }
 0xa9d   :  { %v1676_v61 = vpop.f32.mrb[27].mxu0 }
 0xa9e   :  { %v1291_v62 = vpop.f32.mrb[40].mxu1 }
 0xa9f   :  { %v1297_v63 = vpack.c.bf16 %v1291_v62, %v1242_v58  ;;  %v1681_v0 = vpop.f32.mrb[41].mxu1 }
 0xaa0   :  { %v1294_v44 = vpop.f32.mrb[42].mxu1 }
 0xaa1   :  { %1299 = vrot.lane.b32.xlu0 %v1297_v63, %s1895_s2  ;;  %v1682_v2 = vpop.f32.mrb[43].mxu1 }
 0xb13   :  { %v1300_v3 = vpop.permute.xlu0 %1299 }
 0xb14   :  { %1303 = vst.msk [vmem:[#allocation3] sm:$0xff] %vm1302_vm6, %v1300_v3 }
 0xb1b   :  { %v1304_v4 = vld [vmem:[#allocation3] sm:$0xff] }
 0xb1c   :  { %1700 = vmatmul.mubr.bf16.vlgmr.msra.gmra.mrb[28].mxu0 %v1304_v4 }
 0xbef   :  { %v1410_v5 = vpop.f32.mrb[28].mxu0 }
 0xbf0   :  { %v1411_v6 = vadd.f32 %v1502_v1, %v1410_v5  ;;  %v1701_v7 = vpop.f32.mrb[29].mxu0 }
 0xbf1   :  { %v1413_v8 = vpop.f32.mrb[30].mxu0 }
 0xbf2   :  { %1417 = vst [vmem:[#allocation10] sm:$0xff] %v1411_v6  ;;  %v1414_v9 = vadd.f32 %v1502_v1, %v1413_v8  ;;  %v1702_v10 = vpop.f32.mrb[31].mxu0 }
 0xbf4   :  { %1418 = vst [vmem:[#allocation10 + $0x8] sm:$0xff] %v1414_v9 }
 0xbf5   :  { %1868 = shalt.err (!%p1865_p0)
}
 0xbf6   :  { %s1869_s14 = scalar_lea.hbm %s2176_s5, 256 }
 0xbf7   :  { %p1870_p1 = scmp.ne.s32.totalorder %s2176_s5, %s1869_s14  ;;  %p1873_p2 = scmp.lt.u32.totalorder %s1869_s14, %s2176_s5 }
 0xbf9   :  { %p1875_p3 = pnand %p1873_p2, %p1870_p1 }
 0xbfb   :  { %1878 = shalt.err (!%p1875_p3)
}
 0xbfc   :  { %s1898_s18 = smov 128   ;;  %s1899_s19 = smov 8  }
 0xbfd   :  { %1430 = dma.vmem_to_hbm [thread:$0]  %s1425_s11, 256, %s2176_s5, [#allocation6], %s1898_s18, %s1898_s18, %s1899_s19  }
 0xbfe   :  { %1883 = dma.done.wait [#allocation6], 256  }
 0xbff   :  { %1884 = vsyncadd [#allocation6], 4294967040 }
 0xc00   :  { %1434 = vsyncpa [#allocation5], 1 }
 0xc01   :  { %1435 = vsyncpa [#allocation8], 1 }
 0xc02   :  { %1436 = vsyncpa [#allocation6], 1 }

</bundles_post_ra>
